<compile_context>
chip_gen: v6e
topology: v6e:2x2x1
jax: 0.10.0
libtpu: 0.0.40
codegen_flags: <defaults>
</compile_context>

<pallas_src>
import math
import functools

import jax
import jax.numpy as jnp
from jax import lax
from jax.experimental import pallas as pl
from jax.experimental.pallas import tpu as pltpu


def _mha_kernel(*refs, num_heads, latent_dim, nq, nk, batch_block,
                inv_sqrt_d, use_mask):
    if use_mask:
        q_ref, k_ref, mask_ref, wq_ref, wk_ref, wv_ref, wo_ref, o_ref = refs
    else:
        q_ref, k_ref, wq_ref, wk_ref, wv_ref, wo_ref, o_ref = refs
        mask_ref = None

    f32 = jnp.float32
    query = q_ref[...].astype(f32)    # [TB*NQ, E]
    keys = k_ref[...].astype(f32)     # [TB*NK, E]
    wq = wq_ref[...].astype(f32)      # [E, NH*D]
    wk = wk_ref[...].astype(f32)      # [E, NH*D]
    wv = wv_ref[...].astype(f32)      # [E, NH*D]
    wo = wo_ref[...].astype(f32)      # [NH*D, E]
    e_out = wo.shape[-1]

    # Fused projections: all heads, all batch rows in the block, one matmul each.
    # Fold the 1/sqrt(D) scale into Q instead of scaling the score matrix.
    q_all = jnp.dot(query, wq, preferred_element_type=f32) * inv_sqrt_d  # [TB*NQ, NH*D]
    k_all = jnp.dot(keys, wk, preferred_element_type=f32)                # [TB*NK, NH*D]
    v_all = jnp.dot(keys, wv, preferred_element_type=f32)                # [TB*NK, NH*D]

    d = latent_dim
    # Small static batch-block / head counts: unrolled Python loops.
    for b in range(batch_block):
        r0 = b * nq
        q_b = q_all[r0:r0 + nq, :]                  # [NQ, NH*D]
        k_b = k_all[b * nk:(b + 1) * nk, :]         # [NK, NH*D]
        v_b = v_all[b * nk:(b + 1) * nk, :]         # [NK, NH*D]
        if use_mask:
            keep = mask_ref[b] != 0                 # [NQ, NK]

        out_b = jnp.zeros((nq, e_out), dtype=f32)
        for h in range(num_heads):
            c0 = h * d
            qh = q_b[:, c0:c0 + d]                  # [NQ, D]
            kh = k_b[:, c0:c0 + d]                  # [NK, D]
            vh = v_b[:, c0:c0 + d]                  # [NK, D]

            # score[i, j] = <q_i, k_j> / sqrt(D)  (scale already folded into q)
            # Contract last dims directly -> no explicit transpose of K.
            score = lax.dot_general(qh, kh, (((1,), (1,)), ((), ())),
                                    preferred_element_type=f32)          # [NQ, NK]

            if use_mask:
                # Binary mask: identical to score*mask + (-1e8)*(1-mask).
                score = jnp.where(keep, score, -100000000.0)

            # Numerically-stable softmax over keys (all f32 on the VPU/EUP).
            m = jnp.max(score, axis=-1, keepdims=True)
            p = jnp.exp(score - m)
            denom = jnp.sum(p, axis=-1, keepdims=True)
            attn = p * pl.reciprocal(denom, approx=True)

            out_h = jnp.dot(attn, vh, preferred_element_type=f32)        # [NQ, D]
            # Output projection with the matching sublane slice of fused w_o.
            out_b = out_b + jnp.dot(out_h, wo[c0:c0 + d, :],
                                    preferred_element_type=f32)          # [NQ, E]

        o_ref[r0:r0 + nq, :] = out_b.astype(o_ref.dtype)


def _pick_batch_block(B, NQ, NK, E, NHD, bytes_per=4, budget=8 << 20):
    """Largest batch block that divides B, keeps (8,*) sublane alignment and
    stays well inside the default scoped-VMEM limit (double-buffered I/O)."""
    per_b = bytes_per * (2 * NQ * E + NK * E + NQ * NK) * 2
    tb = max(1, min(B, budget // max(per_b, 1)))

    def ok(t):
        if B % t != 0:
            return False
        rows_ok = (t == B) or ((t * NQ) % 8 == 0 and (t * NK) % 8 == 0)
        return rows_ok

    while tb > 1 and not ok(tb):
        tb -= 1
    if not ok(tb):
        tb = B
    return tb


def multi_head_attention(key, query, w_q, w_k, w_v, w_o, mask=None):
    """key: [B, NK, E]; query: [B, NQ, E]; mask: [B, NQ, NK] (binary) or None.
    Returns [B, NQ, E]."""
    B, NK, E = key.shape
    _, NQ, _ = query.shape
    NH, _, D = w_q.shape
    NHD = NH * D

    # Fuse heads into the lane axis (done once in XLA, outside the kernel).
    wq_all = jnp.transpose(w_q, (1, 0, 2)).reshape(E, NHD)   # [E, NH*D]
    wk_all = jnp.transpose(w_k, (1, 0, 2)).reshape(E, NHD)
    wv_all = jnp.transpose(w_v, (1, 0, 2)).reshape(E, NHD)
    wo_all = w_o.reshape(NHD, E)                             # [NH*D, E]

    # Fold batch rows into the matmul M dimension.
    q2d = query.reshape(B * NQ, E)
    k2d = key.reshape(B * NK, E)

    TB = _pick_batch_block(B, NQ, NK, E, NHD)
    grid = (B // TB,)
    use_mask = mask is not None

    in_specs = [
        pl.BlockSpec((TB * NQ, E), lambda b: (b, 0)),   # query rows
        pl.BlockSpec((TB * NK, E), lambda b: (b, 0)),   # key rows
    ]
    args = [q2d, k2d]
    if use_mask:
        in_specs.append(pl.BlockSpec((TB, NQ, NK), lambda b: (b, 0, 0)))
        args.append(mask)
    in_specs += [
        pl.BlockSpec((E, NHD), lambda b: (0, 0)),       # w_q fused
        pl.BlockSpec((E, NHD), lambda b: (0, 0)),       # w_k fused
        pl.BlockSpec((E, NHD), lambda b: (0, 0)),       # w_v fused
        pl.BlockSpec((NHD, E), lambda b: (0, 0)),       # w_o fused
    ]
    args += [wq_all, wk_all, wv_all, wo_all]

    kernel = functools.partial(
        _mha_kernel,
        num_heads=NH, latent_dim=D, nq=NQ, nk=NK, batch_block=TB,
        inv_sqrt_d=1.0 / math.sqrt(D), use_mask=use_mask)

    out2d = pl.pallas_call(
        kernel,
        out_shape=jax.ShapeDtypeStruct((B * NQ, E), query.dtype),
        grid_spec=pltpu.PrefetchScalarGridSpec(
            num_scalar_prefetch=0,
            grid=grid,
            in_specs=in_specs,
            out_specs=pl.BlockSpec((TB * NQ, E), lambda b: (b, 0)),
        ),
        compiler_params=pltpu.CompilerParams(
            dimension_semantics=("parallel",)),
    )(*args)

    return out2d.reshape(B, NQ, E)


def _xavier_normal(rng, shape, dtype=jnp.float32):
    # Matches torch.nn.init.xavier_normal_ fan computation for 3-D tensors.
    receptive = 1
    for s in shape[2:]:
        receptive *= s
    fan_in = shape[1] * receptive
    fan_out = shape[0] * receptive
    std = math.sqrt(2.0 / (fan_in + fan_out))
    return std * jax.random.normal(rng, shape, dtype=dtype)


def _reference(key, query, w_q, w_k, w_v, w_o, mask=None):
    q = jnp.einsum('blj,njd->bnld', query, w_q)
    k = jnp.einsum('blj,njd->bnld', key, w_k)
    v = jnp.einsum('blj,njd->bnld', key, w_v)
    score = jnp.einsum('bnij,bnkj->bnik', q, k) / math.sqrt(w_q.shape[-1])
    if mask is not None:
        m = mask[:, None]
        score = score * m + (-100000000.0) * (1 - m)
    score = jax.nn.softmax(score, axis=-1)
    out = jnp.einsum('bnij,bnjk->bnik', score, v)
    return jnp.einsum('bnlj,njk->blk', out, w_o)


if __name__ == "__main__":
    # Small shapes consistent with the module's forward.
    B, NQ, NK, E = 2, 8, 8, 32
    NH, D = 4, 16

    root = jax.random.PRNGKey(0)
    k0, k1, k2, k3, k4, k5, k6 = jax.random.split(root, 7)

    query = jax.random.normal(k0, (B, NQ, E), dtype=jnp.float32)
    key = jax.random.normal(k1, (B, NK, E), dtype=jnp.float32)
    mask = (jax.random.uniform(k2, (B, NQ, NK)) > 0.2).astype(jnp.float32)

    w_q = _xavier_normal(k3, (NH, E, D))
    w_k = _xavier_normal(k4, (NH, E, D))
    w_v = _xavier_normal(k5, (NH, E, D))
    w_o = _xavier_normal(k6, (NH, D, E))

    # dropout=None in __init__ -> nn.Identity(); nothing to do.
    out = multi_head_attention(key, query, w_q, w_k, w_v, w_o, mask=mask)
    out = jax.block_until_ready(out)

    # Also exercise the static no-mask path (skips the mask input entirely).
    out_nomask = multi_head_attention(key, query, w_q, w_k, w_v, w_o, mask=None)
    out_nomask = jax.block_until_ready(out_nomask)

    ref = _reference(key, query, w_q, w_k, w_v, w_o, mask=mask)
    ref_nomask = _reference(key, query, w_q, w_k, w_v, w_o, mask=None)

    assert out.shape == (B, NQ, E)
    # Slightly relaxed tolerance to cover pl.reciprocal(approx=True) in softmax.
    assert jnp.allclose(out, ref, atol=1e-3, rtol=1e-3), "mismatch vs reference (masked)"
    assert jnp.allclose(out_nomask, ref_nomask, atol=1e-3, rtol=1e-3), \
        "mismatch vs reference (no mask)"

    print("KERNEL_OK")
</pallas_src>

<mosaic_0001>
module attributes {stable_mosaic.version = 11 : i64} {
  func.func @_mha_kernel(%arg0: i32, %arg1: memref<16x32xf32, #tpu.memory_space<vmem>>, %arg2: memref<16x32xf32, #tpu.memory_space<vmem>>, %arg3: memref<2x8x8xf32, #tpu.memory_space<vmem>>, %arg4: memref<32x64xf32, #tpu.memory_space<vmem>>, %arg5: memref<32x64xf32, #tpu.memory_space<vmem>>, %arg6: memref<32x64xf32, #tpu.memory_space<vmem>>, %arg7: memref<64x32xf32, #tpu.memory_space<vmem>>, %arg8: memref<16x32xf32, #tpu.memory_space<vmem>>) attributes {dimension_semantics = [#tpu.dimension_semantics<parallel>], iteration_bounds = array<i64: 1>, scalar_prefetch = 0 : i64, scratch_operands = 0 : i64, tpu.core_type = #tpu.core_type<tc>, window_params = [{transform_indices = @transform_0, window_bounds = array<i64: 16, 32>}, {transform_indices = @transform_1, window_bounds = array<i64: 16, 32>}, {transform_indices = @transform_2, window_bounds = array<i64: 2, 8, 8>}, {pipeline_mode = #tpu.pipeline_mode<synchronous>, transform_indices = @transform_3, window_bounds = array<i64: 32, 64>}, {pipeline_mode = #tpu.pipeline_mode<synchronous>, transform_indices = @transform_4, window_bounds = array<i64: 32, 64>}, {pipeline_mode = #tpu.pipeline_mode<synchronous>, transform_indices = @transform_5, window_bounds = array<i64: 32, 64>}, {pipeline_mode = #tpu.pipeline_mode<synchronous>, transform_indices = @transform_6, window_bounds = array<i64: 64, 32>}, {transform_indices = @transform_7, window_bounds = array<i64: 16, 32>}]} {
    %c0 = arith.constant 0 : index
    %c0_0 = arith.constant 0 : index
    %0 = vector.load %arg1[%c0, %c0_0] : memref<16x32xf32, #tpu.memory_space<vmem>>, vector<16x32xf32>
    %c0_1 = arith.constant 0 : index
    %c0_2 = arith.constant 0 : index
    %1 = vector.load %arg2[%c0_1, %c0_2] : memref<16x32xf32, #tpu.memory_space<vmem>>, vector<16x32xf32>
    %c0_3 = arith.constant 0 : index
    %c0_4 = arith.constant 0 : index
    %2 = vector.load %arg4[%c0_3, %c0_4] : memref<32x64xf32, #tpu.memory_space<vmem>>, vector<32x64xf32>
    %c0_5 = arith.constant 0 : index
    %c0_6 = arith.constant 0 : index
    %3 = vector.load %arg5[%c0_5, %c0_6] : memref<32x64xf32, #tpu.memory_space<vmem>>, vector<32x64xf32>
    %c0_7 = arith.constant 0 : index
    %c0_8 = arith.constant 0 : index
    %4 = vector.load %arg6[%c0_7, %c0_8] : memref<32x64xf32, #tpu.memory_space<vmem>>, vector<32x64xf32>
    %c0_9 = arith.constant 0 : index
    %c0_10 = arith.constant 0 : index
    %5 = vector.load %arg7[%c0_9, %c0_10] : memref<64x32xf32, #tpu.memory_space<vmem>>, vector<64x32xf32>
    %cst = arith.constant dense<0.000000e+00> : vector<16x64xf32>
    %6 = tpu.matmul %0, %2, %cst {dimension_numbers = #tpu.dot_dimension_numbers<[1], [0], [0], [1], [0, 0, 1, 1], [], []>} : vector<16x32xf32>, vector<32x64xf32>, vector<16x64xf32> -> vector<16x64xf32>
    %cst_11 = arith.constant 2.500000e-01 : f32
    %7 = vector.broadcast %cst_11 : f32 to vector<16x64xf32>
    %8 = arith.mulf %6, %7 : vector<16x64xf32>
    %cst_12 = arith.constant dense<0.000000e+00> : vector<16x64xf32>
    %9 = tpu.matmul %1, %3, %cst_12 {dimension_numbers = #tpu.dot_dimension_numbers<[1], [0], [0], [1], [0, 0, 1, 1], [], []>} : vector<16x32xf32>, vector<32x64xf32>, vector<16x64xf32> -> vector<16x64xf32>
    %cst_13 = arith.constant dense<0.000000e+00> : vector<16x64xf32>
    %10 = tpu.matmul %1, %4, %cst_13 {dimension_numbers = #tpu.dot_dimension_numbers<[1], [0], [0], [1], [0, 0, 1, 1], [], []>} : vector<16x32xf32>, vector<32x64xf32>, vector<16x64xf32> -> vector<16x64xf32>
    %11 = vector.extract_strided_slice %8 {offsets = [0, 0], sizes = [8, 64], strides = [1, 1]} : vector<16x64xf32> to vector<8x64xf32>
    %12 = vector.extract_strided_slice %9 {offsets = [0, 0], sizes = [8, 64], strides = [1, 1]} : vector<16x64xf32> to vector<8x64xf32>
    %13 = vector.extract_strided_slice %10 {offsets = [0, 0], sizes = [8, 64], strides = [1, 1]} : vector<16x64xf32> to vector<8x64xf32>
    %c0_14 = arith.constant 0 : index
    %c0_15 = arith.constant 0 : index
    %c0_16 = arith.constant 0 : index
    %14 = vector.load %arg3[%c0_14, %c0_15, %c0_16] : memref<2x8x8xf32, #tpu.memory_space<vmem>>, vector<1x8x8xf32>
    %15 = vector.shape_cast %14 : vector<1x8x8xf32> to vector<8x8xf32>
    %cst_17 = arith.constant 0.000000e+00 : f32
    %16 = vector.broadcast %cst_17 : f32 to vector<8x8xf32>
    %17 = arith.cmpf one, %15, %16 : vector<8x8xf32>
    %cst_18 = arith.constant 0.000000e+00 : f32
    %18 = vector.broadcast %cst_18 : f32 to vector<8x32xf32>
    %19 = vector.extract_strided_slice %11 {offsets = [0, 0], sizes = [8, 16], strides = [1, 1]} : vector<8x64xf32> to vector<8x16xf32>
    %20 = vector.extract_strided_slice %12 {offsets = [0, 0], sizes = [8, 16], strides = [1, 1]} : vector<8x64xf32> to vector<8x16xf32>
    %21 = vector.extract_strided_slice %13 {offsets = [0, 0], sizes = [8, 16], strides = [1, 1]} : vector<8x64xf32> to vector<8x16xf32>
    %cst_19 = arith.constant dense<0.000000e+00> : vector<8x8xf32>
    %22 = tpu.matmul %19, %20, %cst_19 {dimension_numbers = #tpu.dot_dimension_numbers<[1], [1], [0], [0], [0, 0, 1, 0], [], []>} : vector<8x16xf32>, vector<8x16xf32>, vector<8x8xf32> -> vector<8x8xf32>
    %cst_20 = arith.constant -1.000000e+08 : f32
    %23 = vector.broadcast %cst_20 : f32 to vector<8x8xf32>
    %24 = arith.select %17, %22, %23 : vector<8x8xi1>, vector<8x8xf32>
    %cst_21 = arith.constant dense<0xFF800000> : vector<8xf32>
    %25 = vector.multi_reduction <maximumf>, %24, %cst_21 [1] : vector<8x8xf32> to vector<8xf32>
    %26 = vector.shape_cast %25 : vector<8xf32> to vector<8x1xf32>
    %27 = vector.broadcast %26 : vector<8x1xf32> to vector<8x8xf32>
    %28 = arith.subf %24, %27 : vector<8x8xf32>
    %29 = math.exp %28 : vector<8x8xf32>
    %cst_22 = arith.constant dense<0.000000e+00> : vector<8xf32>
    %30 = vector.multi_reduction <add>, %29, %cst_22 [1] : vector<8x8xf32> to vector<8xf32>
    %31 = vector.shape_cast %30 : vector<8xf32> to vector<8x1xf32>
    %32 = tpu.reciprocal %31 {approx = true} : vector<8x1xf32> -> vector<8x1xf32>
    %33 = vector.broadcast %32 : vector<8x1xf32> to vector<8x8xf32>
    %34 = arith.mulf %29, %33 : vector<8x8xf32>
    %cst_23 = arith.constant dense<0.000000e+00> : vector<8x16xf32>
    %35 = tpu.matmul %34, %21, %cst_23 {dimension_numbers = #tpu.dot_dimension_numbers<[1], [0], [0], [1], [0, 0, 1, 1], [], []>} : vector<8x8xf32>, vector<8x16xf32>, vector<8x16xf32> -> vector<8x16xf32>
    %36 = vector.extract_strided_slice %5 {offsets = [0, 0], sizes = [16, 32], strides = [1, 1]} : vector<64x32xf32> to vector<16x32xf32>
    %cst_24 = arith.constant dense<0.000000e+00> : vector<8x32xf32>
    %37 = tpu.matmul %35, %36, %cst_24 {dimension_numbers = #tpu.dot_dimension_numbers<[1], [0], [0], [1], [0, 0, 1, 1], [], []>} : vector<8x16xf32>, vector<16x32xf32>, vector<8x32xf32> -> vector<8x32xf32>
    %38 = arith.addf %18, %37 : vector<8x32xf32>
    %39 = vector.extract_strided_slice %11 {offsets = [0, 16], sizes = [8, 16], strides = [1, 1]} : vector<8x64xf32> to vector<8x16xf32>
    %40 = vector.extract_strided_slice %12 {offsets = [0, 16], sizes = [8, 16], strides = [1, 1]} : vector<8x64xf32> to vector<8x16xf32>
    %41 = vector.extract_strided_slice %13 {offsets = [0, 16], sizes = [8, 16], strides = [1, 1]} : vector<8x64xf32> to vector<8x16xf32>
    %cst_25 = arith.constant dense<0.000000e+00> : vector<8x8xf32>
    %42 = tpu.matmul %39, %40, %cst_25 {dimension_numbers = #tpu.dot_dimension_numbers<[1], [1], [0], [0], [0, 0, 1, 0], [], []>} : vector<8x16xf32>, vector<8x16xf32>, vector<8x8xf32> -> vector<8x8xf32>
    %cst_26 = arith.constant -1.000000e+08 : f32
    %43 = vector.broadcast %cst_26 : f32 to vector<8x8xf32>
    %44 = arith.select %17, %42, %43 : vector<8x8xi1>, vector<8x8xf32>
    %cst_27 = arith.constant dense<0xFF800000> : vector<8xf32>
    %45 = vector.multi_reduction <maximumf>, %44, %cst_27 [1] : vector<8x8xf32> to vector<8xf32>
    %46 = vector.shape_cast %45 : vector<8xf32> to vector<8x1xf32>
    %47 = vector.broadcast %46 : vector<8x1xf32> to vector<8x8xf32>
    %48 = arith.subf %44, %47 : vector<8x8xf32>
    %49 = math.exp %48 : vector<8x8xf32>
    %cst_28 = arith.constant dense<0.000000e+00> : vector<8xf32>
    %50 = vector.multi_reduction <add>, %49, %cst_28 [1] : vector<8x8xf32> to vector<8xf32>
    %51 = vector.shape_cast %50 : vector<8xf32> to vector<8x1xf32>
    %52 = tpu.reciprocal %51 {approx = true} : vector<8x1xf32> -> vector<8x1xf32>
    %53 = vector.broadcast %52 : vector<8x1xf32> to vector<8x8xf32>
    %54 = arith.mulf %49, %53 : vector<8x8xf32>
    %cst_29 = arith.constant dense<0.000000e+00> : vector<8x16xf32>
    %55 = tpu.matmul %54, %41, %cst_29 {dimension_numbers = #tpu.dot_dimension_numbers<[1], [0], [0], [1], [0, 0, 1, 1], [], []>} : vector<8x8xf32>, vector<8x16xf32>, vector<8x16xf32> -> vector<8x16xf32>
    %56 = vector.extract_strided_slice %5 {offsets = [16, 0], sizes = [16, 32], strides = [1, 1]} : vector<64x32xf32> to vector<16x32xf32>
    %cst_30 = arith.constant dense<0.000000e+00> : vector<8x32xf32>
    %57 = tpu.matmul %55, %56, %cst_30 {dimension_numbers = #tpu.dot_dimension_numbers<[1], [0], [0], [1], [0, 0, 1, 1], [], []>} : vector<8x16xf32>, vector<16x32xf32>, vector<8x32xf32> -> vector<8x32xf32>
    %58 = arith.addf %38, %57 : vector<8x32xf32>
    %59 = vector.extract_strided_slice %11 {offsets = [0, 32], sizes = [8, 16], strides = [1, 1]} : vector<8x64xf32> to vector<8x16xf32>
    %60 = vector.extract_strided_slice %12 {offsets = [0, 32], sizes = [8, 16], strides = [1, 1]} : vector<8x64xf32> to vector<8x16xf32>
    %61 = vector.extract_strided_slice %13 {offsets = [0, 32], sizes = [8, 16], strides = [1, 1]} : vector<8x64xf32> to vector<8x16xf32>
    %cst_31 = arith.constant dense<0.000000e+00> : vector<8x8xf32>
    %62 = tpu.matmul %59, %60, %cst_31 {dimension_numbers = #tpu.dot_dimension_numbers<[1], [1], [0], [0], [0, 0, 1, 0], [], []>} : vector<8x16xf32>, vector<8x16xf32>, vector<8x8xf32> -> vector<8x8xf32>
    %cst_32 = arith.constant -1.000000e+08 : f32
    %63 = vector.broadcast %cst_32 : f32 to vector<8x8xf32>
    %64 = arith.select %17, %62, %63 : vector<8x8xi1>, vector<8x8xf32>
    %cst_33 = arith.constant dense<0xFF800000> : vector<8xf32>
    %65 = vector.multi_reduction <maximumf>, %64, %cst_33 [1] : vector<8x8xf32> to vector<8xf32>
    %66 = vector.shape_cast %65 : vector<8xf32> to vector<8x1xf32>
    %67 = vector.broadcast %66 : vector<8x1xf32> to vector<8x8xf32>
    %68 = arith.subf %64, %67 : vector<8x8xf32>
    %69 = math.exp %68 : vector<8x8xf32>
    %cst_34 = arith.constant dense<0.000000e+00> : vector<8xf32>
    %70 = vector.multi_reduction <add>, %69, %cst_34 [1] : vector<8x8xf32> to vector<8xf32>
    %71 = vector.shape_cast %70 : vector<8xf32> to vector<8x1xf32>
    %72 = tpu.reciprocal %71 {approx = true} : vector<8x1xf32> -> vector<8x1xf32>
    %73 = vector.broadcast %72 : vector<8x1xf32> to vector<8x8xf32>
    %74 = arith.mulf %69, %73 : vector<8x8xf32>
    %cst_35 = arith.constant dense<0.000000e+00> : vector<8x16xf32>
    %75 = tpu.matmul %74, %61, %cst_35 {dimension_numbers = #tpu.dot_dimension_numbers<[1], [0], [0], [1], [0, 0, 1, 1], [], []>} : vector<8x8xf32>, vector<8x16xf32>, vector<8x16xf32> -> vector<8x16xf32>
    %76 = vector.extract_strided_slice %5 {offsets = [32, 0], sizes = [16, 32], strides = [1, 1]} : vector<64x32xf32> to vector<16x32xf32>
    %cst_36 = arith.constant dense<0.000000e+00> : vector<8x32xf32>
    %77 = tpu.matmul %75, %76, %cst_36 {dimension_numbers = #tpu.dot_dimension_numbers<[1], [0], [0], [1], [0, 0, 1, 1], [], []>} : vector<8x16xf32>, vector<16x32xf32>, vector<8x32xf32> -> vector<8x32xf32>
    %78 = arith.addf %58, %77 : vector<8x32xf32>
    %79 = vector.extract_strided_slice %11 {offsets = [0, 48], sizes = [8, 16], strides = [1, 1]} : vector<8x64xf32> to vector<8x16xf32>
    %80 = vector.extract_strided_slice %12 {offsets = [0, 48], sizes = [8, 16], strides = [1, 1]} : vector<8x64xf32> to vector<8x16xf32>
    %81 = vector.extract_strided_slice %13 {offsets = [0, 48], sizes = [8, 16], strides = [1, 1]} : vector<8x64xf32> to vector<8x16xf32>
    %cst_37 = arith.constant dense<0.000000e+00> : vector<8x8xf32>
    %82 = tpu.matmul %79, %80, %cst_37 {dimension_numbers = #tpu.dot_dimension_numbers<[1], [1], [0], [0], [0, 0, 1, 0], [], []>} : vector<8x16xf32>, vector<8x16xf32>, vector<8x8xf32> -> vector<8x8xf32>
    %cst_38 = arith.constant -1.000000e+08 : f32
    %83 = vector.broadcast %cst_38 : f32 to vector<8x8xf32>
    %84 = arith.select %17, %82, %83 : vector<8x8xi1>, vector<8x8xf32>
    %cst_39 = arith.constant dense<0xFF800000> : vector<8xf32>
    %85 = vector.multi_reduction <maximumf>, %84, %cst_39 [1] : vector<8x8xf32> to vector<8xf32>
    %86 = vector.shape_cast %85 : vector<8xf32> to vector<8x1xf32>
    %87 = vector.broadcast %86 : vector<8x1xf32> to vector<8x8xf32>
    %88 = arith.subf %84, %87 : vector<8x8xf32>
    %89 = math.exp %88 : vector<8x8xf32>
    %cst_40 = arith.constant dense<0.000000e+00> : vector<8xf32>
    %90 = vector.multi_reduction <add>, %89, %cst_40 [1] : vector<8x8xf32> to vector<8xf32>
    %91 = vector.shape_cast %90 : vector<8xf32> to vector<8x1xf32>
    %92 = tpu.reciprocal %91 {approx = true} : vector<8x1xf32> -> vector<8x1xf32>
    %93 = vector.broadcast %92 : vector<8x1xf32> to vector<8x8xf32>
    %94 = arith.mulf %89, %93 : vector<8x8xf32>
    %cst_41 = arith.constant dense<0.000000e+00> : vector<8x16xf32>
    %95 = tpu.matmul %94, %81, %cst_41 {dimension_numbers = #tpu.dot_dimension_numbers<[1], [0], [0], [1], [0, 0, 1, 1], [], []>} : vector<8x8xf32>, vector<8x16xf32>, vector<8x16xf32> -> vector<8x16xf32>
    %96 = vector.extract_strided_slice %5 {offsets = [48, 0], sizes = [16, 32], strides = [1, 1]} : vector<64x32xf32> to vector<16x32xf32>
    %cst_42 = arith.constant dense<0.000000e+00> : vector<8x32xf32>
    %97 = tpu.matmul %95, %96, %cst_42 {dimension_numbers = #tpu.dot_dimension_numbers<[1], [0], [0], [1], [0, 0, 1, 1], [], []>} : vector<8x16xf32>, vector<16x32xf32>, vector<8x32xf32> -> vector<8x32xf32>
    %98 = arith.addf %78, %97 : vector<8x32xf32>
    %c0_43 = arith.constant 0 : index
    %c0_44 = arith.constant 0 : index
    %99 = vector.load %arg8[%c0_43, %c0_44] : memref<16x32xf32, #tpu.memory_space<vmem>>, vector<8x32xf32>
    tpu.vector_store %arg8[%c0_43, %c0_44], %98 {strides = array<i32>} : memref<16x32xf32, #tpu.memory_space<vmem>>, vector<8x32xf32>,
    %100 = vector.extract_strided_slice %8 {offsets = [8, 0], sizes = [8, 64], strides = [1, 1]} : vector<16x64xf32> to vector<8x64xf32>
    %101 = vector.extract_strided_slice %9 {offsets = [8, 0], sizes = [8, 64], strides = [1, 1]} : vector<16x64xf32> to vector<8x64xf32>
    %102 = vector.extract_strided_slice %10 {offsets = [8, 0], sizes = [8, 64], strides = [1, 1]} : vector<16x64xf32> to vector<8x64xf32>
    %c1 = arith.constant 1 : index
    %c0_45 = arith.constant 0 : index
    %c0_46 = arith.constant 0 : index
    %103 = vector.load %arg3[%c1, %c0_45, %c0_46] : memref<2x8x8xf32, #tpu.memory_space<vmem>>, vector<1x8x8xf32>
    %104 = vector.shape_cast %103 : vector<1x8x8xf32> to vector<8x8xf32>
    %cst_47 = arith.constant 0.000000e+00 : f32
    %105 = vector.broadcast %cst_47 : f32 to vector<8x8xf32>
    %106 = arith.cmpf one, %104, %105 : vector<8x8xf32>
    %cst_48 = arith.constant 0.000000e+00 : f32
    %107 = vector.broadcast %cst_48 : f32 to vector<8x32xf32>
    %108 = vector.extract_strided_slice %100 {offsets = [0, 0], sizes = [8, 16], strides = [1, 1]} : vector<8x64xf32> to vector<8x16xf32>
    %109 = vector.extract_strided_slice %101 {offsets = [0, 0], sizes = [8, 16], strides = [1, 1]} : vector<8x64xf32> to vector<8x16xf32>
    %110 = vector.extract_strided_slice %102 {offsets = [0, 0], sizes = [8, 16], strides = [1, 1]} : vector<8x64xf32> to vector<8x16xf32>
    %cst_49 = arith.constant dense<0.000000e+00> : vector<8x8xf32>
    %111 = tpu.matmul %108, %109, %cst_49 {dimension_numbers = #tpu.dot_dimension_numbers<[1], [1], [0], [0], [0, 0, 1, 0], [], []>} : vector<8x16xf32>, vector<8x16xf32>, vector<8x8xf32> -> vector<8x8xf32>
    %cst_50 = arith.constant -1.000000e+08 : f32
    %112 = vector.broadcast %cst_50 : f32 to vector<8x8xf32>
    %113 = arith.select %106, %111, %112 : vector<8x8xi1>, vector<8x8xf32>
    %cst_51 = arith.constant dense<0xFF800000> : vector<8xf32>
    %114 = vector.multi_reduction <maximumf>, %113, %cst_51 [1] : vector<8x8xf32> to vector<8xf32>
    %115 = vector.shape_cast %114 : vector<8xf32> to vector<8x1xf32>
    %116 = vector.broadcast %115 : vector<8x1xf32> to vector<8x8xf32>
    %117 = arith.subf %113, %116 : vector<8x8xf32>
    %118 = math.exp %117 : vector<8x8xf32>
    %cst_52 = arith.constant dense<0.000000e+00> : vector<8xf32>
    %119 = vector.multi_reduction <add>, %118, %cst_52 [1] : vector<8x8xf32> to vector<8xf32>
    %120 = vector.shape_cast %119 : vector<8xf32> to vector<8x1xf32>
    %121 = tpu.reciprocal %120 {approx = true} : vector<8x1xf32> -> vector<8x1xf32>
    %122 = vector.broadcast %121 : vector<8x1xf32> to vector<8x8xf32>
    %123 = arith.mulf %118, %122 : vector<8x8xf32>
    %cst_53 = arith.constant dense<0.000000e+00> : vector<8x16xf32>
    %124 = tpu.matmul %123, %110, %cst_53 {dimension_numbers = #tpu.dot_dimension_numbers<[1], [0], [0], [1], [0, 0, 1, 1], [], []>} : vector<8x8xf32>, vector<8x16xf32>, vector<8x16xf32> -> vector<8x16xf32>
    %125 = vector.extract_strided_slice %5 {offsets = [0, 0], sizes = [16, 32], strides = [1, 1]} : vector<64x32xf32> to vector<16x32xf32>
    %cst_54 = arith.constant dense<0.000000e+00> : vector<8x32xf32>
    %126 = tpu.matmul %124, %125, %cst_54 {dimension_numbers = #tpu.dot_dimension_numbers<[1], [0], [0], [1], [0, 0, 1, 1], [], []>} : vector<8x16xf32>, vector<16x32xf32>, vector<8x32xf32> -> vector<8x32xf32>
    %127 = arith.addf %107, %126 : vector<8x32xf32>
    %128 = vector.extract_strided_slice %100 {offsets = [0, 16], sizes = [8, 16], strides = [1, 1]} : vector<8x64xf32> to vector<8x16xf32>
    %129 = vector.extract_strided_slice %101 {offsets = [0, 16], sizes = [8, 16], strides = [1, 1]} : vector<8x64xf32> to vector<8x16xf32>
    %130 = vector.extract_strided_slice %102 {offsets = [0, 16], sizes = [8, 16], strides = [1, 1]} : vector<8x64xf32> to vector<8x16xf32>
    %cst_55 = arith.constant dense<0.000000e+00> : vector<8x8xf32>
    %131 = tpu.matmul %128, %129, %cst_55 {dimension_numbers = #tpu.dot_dimension_numbers<[1], [1], [0], [0], [0, 0, 1, 0], [], []>} : vector<8x16xf32>, vector<8x16xf32>, vector<8x8xf32> -> vector<8x8xf32>
    %cst_56 = arith.constant -1.000000e+08 : f32
    %132 = vector.broadcast %cst_56 : f32 to vector<8x8xf32>
    %133 = arith.select %106, %131, %132 : vector<8x8xi1>, vector<8x8xf32>
    %cst_57 = arith.constant dense<0xFF800000> : vector<8xf32>
    %134 = vector.multi_reduction <maximumf>, %133, %cst_57 [1] : vector<8x8xf32> to vector<8xf32>
    %135 = vector.shape_cast %134 : vector<8xf32> to vector<8x1xf32>
    %136 = vector.broadcast %135 : vector<8x1xf32> to vector<8x8xf32>
    %137 = arith.subf %133, %136 : vector<8x8xf32>
    %138 = math.exp %137 : vector<8x8xf32>
    %cst_58 = arith.constant dense<0.000000e+00> : vector<8xf32>
    %139 = vector.multi_reduction <add>, %138, %cst_58 [1] : vector<8x8xf32> to vector<8xf32>
    %140 = vector.shape_cast %139 : vector<8xf32> to vector<8x1xf32>
    %141 = tpu.reciprocal %140 {approx = true} : vector<8x1xf32> -> vector<8x1xf32>
    %142 = vector.broadcast %141 : vector<8x1xf32> to vector<8x8xf32>
    %143 = arith.mulf %138, %142 : vector<8x8xf32>
    %cst_59 = arith.constant dense<0.000000e+00> : vector<8x16xf32>
    %144 = tpu.matmul %143, %130, %cst_59 {dimension_numbers = #tpu.dot_dimension_numbers<[1], [0], [0], [1], [0, 0, 1, 1], [], []>} : vector<8x8xf32>, vector<8x16xf32>, vector<8x16xf32> -> vector<8x16xf32>
    %145 = vector.extract_strided_slice %5 {offsets = [16, 0], sizes = [16, 32], strides = [1, 1]} : vector<64x32xf32> to vector<16x32xf32>
    %cst_60 = arith.constant dense<0.000000e+00> : vector<8x32xf32>
    %146 = tpu.matmul %144, %145, %cst_60 {dimension_numbers = #tpu.dot_dimension_numbers<[1], [0], [0], [1], [0, 0, 1, 1], [], []>} : vector<8x16xf32>, vector<16x32xf32>, vector<8x32xf32> -> vector<8x32xf32>
    %147 = arith.addf %127, %146 : vector<8x32xf32>
    %148 = vector.extract_strided_slice %100 {offsets = [0, 32], sizes = [8, 16], strides = [1, 1]} : vector<8x64xf32> to vector<8x16xf32>
    %149 = vector.extract_strided_slice %101 {offsets = [0, 32], sizes = [8, 16], strides = [1, 1]} : vector<8x64xf32> to vector<8x16xf32>
    %150 = vector.extract_strided_slice %102 {offsets = [0, 32], sizes = [8, 16], strides = [1, 1]} : vector<8x64xf32> to vector<8x16xf32>
    %cst_61 = arith.constant dense<0.000000e+00> : vector<8x8xf32>
    %151 = tpu.matmul %148, %149, %cst_61 {dimension_numbers = #tpu.dot_dimension_numbers<[1], [1], [0], [0], [0, 0, 1, 0], [], []>} : vector<8x16xf32>, vector<8x16xf32>, vector<8x8xf32> -> vector<8x8xf32>
    %cst_62 = arith.constant -1.000000e+08 : f32
    %152 = vector.broadcast %cst_62 : f32 to vector<8x8xf32>
    %153 = arith.select %106, %151, %152 : vector<8x8xi1>, vector<8x8xf32>
    %cst_63 = arith.constant dense<0xFF800000> : vector<8xf32>
    %154 = vector.multi_reduction <maximumf>, %153, %cst_63 [1] : vector<8x8xf32> to vector<8xf32>
    %155 = vector.shape_cast %154 : vector<8xf32> to vector<8x1xf32>
    %156 = vector.broadcast %155 : vector<8x1xf32> to vector<8x8xf32>
    %157 = arith.subf %153, %156 : vector<8x8xf32>
    %158 = math.exp %157 : vector<8x8xf32>
    %cst_64 = arith.constant dense<0.000000e+00> : vector<8xf32>
    %159 = vector.multi_reduction <add>, %158, %cst_64 [1] : vector<8x8xf32> to vector<8xf32>
    %160 = vector.shape_cast %159 : vector<8xf32> to vector<8x1xf32>
    %161 = tpu.reciprocal %160 {approx = true} : vector<8x1xf32> -> vector<8x1xf32>
    %162 = vector.broadcast %161 : vector<8x1xf32> to vector<8x8xf32>
    %163 = arith.mulf %158, %162 : vector<8x8xf32>
    %cst_65 = arith.constant dense<0.000000e+00> : vector<8x16xf32>
    %164 = tpu.matmul %163, %150, %cst_65 {dimension_numbers = #tpu.dot_dimension_numbers<[1], [0], [0], [1], [0, 0, 1, 1], [], []>} : vector<8x8xf32>, vector<8x16xf32>, vector<8x16xf32> -> vector<8x16xf32>
    %165 = vector.extract_strided_slice %5 {offsets = [32, 0], sizes = [16, 32], strides = [1, 1]} : vector<64x32xf32> to vector<16x32xf32>
    %cst_66 = arith.constant dense<0.000000e+00> : vector<8x32xf32>
    %166 = tpu.matmul %164, %165, %cst_66 {dimension_numbers = #tpu.dot_dimension_numbers<[1], [0], [0], [1], [0, 0, 1, 1], [], []>} : vector<8x16xf32>, vector<16x32xf32>, vector<8x32xf32> -> vector<8x32xf32>
    %167 = arith.addf %147, %166 : vector<8x32xf32>
    %168 = vector.extract_strided_slice %100 {offsets = [0, 48], sizes = [8, 16], strides = [1, 1]} : vector<8x64xf32> to vector<8x16xf32>
    %169 = vector.extract_strided_slice %101 {offsets = [0, 48], sizes = [8, 16], strides = [1, 1]} : vector<8x64xf32> to vector<8x16xf32>
    %170 = vector.extract_strided_slice %102 {offsets = [0, 48], sizes = [8, 16], strides = [1, 1]} : vector<8x64xf32> to vector<8x16xf32>
    %cst_67 = arith.constant dense<0.000000e+00> : vector<8x8xf32>
    %171 = tpu.matmul %168, %169, %cst_67 {dimension_numbers = #tpu.dot_dimension_numbers<[1], [1], [0], [0], [0, 0, 1, 0], [], []>} : vector<8x16xf32>, vector<8x16xf32>, vector<8x8xf32> -> vector<8x8xf32>
    %cst_68 = arith.constant -1.000000e+08 : f32
    %172 = vector.broadcast %cst_68 : f32 to vector<8x8xf32>
    %173 = arith.select %106, %171, %172 : vector<8x8xi1>, vector<8x8xf32>
    %cst_69 = arith.constant dense<0xFF800000> : vector<8xf32>
    %174 = vector.multi_reduction <maximumf>, %173, %cst_69 [1] : vector<8x8xf32> to vector<8xf32>
    %175 = vector.shape_cast %174 : vector<8xf32> to vector<8x1xf32>
    %176 = vector.broadcast %175 : vector<8x1xf32> to vector<8x8xf32>
    %177 = arith.subf %173, %176 : vector<8x8xf32>
    %178 = math.exp %177 : vector<8x8xf32>
    %cst_70 = arith.constant dense<0.000000e+00> : vector<8xf32>
    %179 = vector.multi_reduction <add>, %178, %cst_70 [1] : vector<8x8xf32> to vector<8xf32>
    %180 = vector.shape_cast %179 : vector<8xf32> to vector<8x1xf32>
    %181 = tpu.reciprocal %180 {approx = true} : vector<8x1xf32> -> vector<8x1xf32>
    %182 = vector.broadcast %181 : vector<8x1xf32> to vector<8x8xf32>
    %183 = arith.mulf %178, %182 : vector<8x8xf32>
    %cst_71 = arith.constant dense<0.000000e+00> : vector<8x16xf32>
    %184 = tpu.matmul %183, %170, %cst_71 {dimension_numbers = #tpu.dot_dimension_numbers<[1], [0], [0], [1], [0, 0, 1, 1], [], []>} : vector<8x8xf32>, vector<8x16xf32>, vector<8x16xf32> -> vector<8x16xf32>
    %185 = vector.extract_strided_slice %5 {offsets = [48, 0], sizes = [16, 32], strides = [1, 1]} : vector<64x32xf32> to vector<16x32xf32>
    %cst_72 = arith.constant dense<0.000000e+00> : vector<8x32xf32>
    %186 = tpu.matmul %184, %185, %cst_72 {dimension_numbers = #tpu.dot_dimension_numbers<[1], [0], [0], [1], [0, 0, 1, 1], [], []>} : vector<8x16xf32>, vector<16x32xf32>, vector<8x32xf32> -> vector<8x32xf32>
    %187 = arith.addf %167, %186 : vector<8x32xf32>
    %c8 = arith.constant 8 : index
    %c0_73 = arith.constant 0 : index
    %188 = vector.load %arg8[%c8, %c0_73] : memref<16x32xf32, #tpu.memory_space<vmem>>, vector<8x32xf32>
    tpu.vector_store %arg8[%c8, %c0_73], %187 {strides = array<i32>} : memref<16x32xf32, #tpu.memory_space<vmem>>, vector<8x32xf32>,
    return
  }
  func.func @transform_0(%arg0: i32) -> (i32, i32) {
    %c0_i32 = arith.constant 0 : i32
    %c0_i32_0 = arith.constant 0 : i32
    return %arg0, %c0_i32 : i32, i32
  }
  func.func @transform_1(%arg0: i32) -> (i32, i32) {
    %c0_i32 = arith.constant 0 : i32
    %c0_i32_0 = arith.constant 0 : i32
    return %arg0, %c0_i32 : i32, i32
  }
  func.func @transform_2(%arg0: i32) -> (i32, i32, i32) {
    %c0_i32 = arith.constant 0 : i32
    %c0_i32_0 = arith.constant 0 : i32
    %c0_i32_1 = arith.constant 0 : i32
    return %arg0, %c0_i32, %c0_i32_0 : i32, i32, i32
  }
  func.func @transform_3(%arg0: i32) -> (i32, i32) {
    %c0_i32 = arith.constant 0 : i32
    %c0_i32_0 = arith.constant 0 : i32
    %c0_i32_1 = arith.constant 0 : i32
    return %c0_i32, %c0_i32_0 : i32, i32
  }
  func.func @transform_4(%arg0: i32) -> (i32, i32) {
    %c0_i32 = arith.constant 0 : i32
    %c0_i32_0 = arith.constant 0 : i32
    %c0_i32_1 = arith.constant 0 : i32
    return %c0_i32, %c0_i32_0 : i32, i32
  }
  func.func @transform_5(%arg0: i32) -> (i32, i32) {
    %c0_i32 = arith.constant 0 : i32
    %c0_i32_0 = arith.constant 0 : i32
    %c0_i32_1 = arith.constant 0 : i32
    return %c0_i32, %c0_i32_0 : i32, i32
  }
  func.func @transform_6(%arg0: i32) -> (i32, i32) {
    %c0_i32 = arith.constant 0 : i32
    %c0_i32_0 = arith.constant 0 : i32
    %c0_i32_1 = arith.constant 0 : i32
    return %c0_i32, %c0_i32_0 : i32, i32
  }
  func.func @transform_7(%arg0: i32) -> (i32, i32) {
    %c0_i32 = arith.constant 0 : i32
    %c0_i32_0 = arith.constant 0 : i32
    return %arg0, %c0_i32 : i32, i32
  }
}

</mosaic_0001>

<bundles_post_ra>
// kernel: tpu_custom_call.1
= control target key start
LH: loop header
LB: loop body
LE: loop exit
PB: predicated region body
PF: predicated region fallthrough
CT: control target
= control target key end

     0   :  { %12 = vsyncpa [#allocation3], 0  ;;  %s3062_s0 = inlined_call_operand.hbm [shape: f32[16,32], index: 0, kind: input, shape index: {}]   ;;  %s3063_s1 = inlined_call_operand.hbm [shape: f32[16,32], index: 1, kind: input, shape index: {}]   ;;  %s3064_s2 = inlined_call_operand.hbm [shape: f32[2,8,8], index: 2, kind: input, shape index: {}]   ;;  %s3065_s3 = inlined_call_operand.vmem [shape: f32[32,64], index: 3, kind: input, shape index: {}]   ;;  %s3066_s4 = inlined_call_operand.vmem [shape: f32[32,64], index: 4, kind: input, shape index: {}]   ;;  %s3067_s5 = inlined_call_operand.vmem [shape: f32[32,64], index: 5, kind: input, shape index: {}]   ;;  %s3068_s6 = inlined_call_operand.vmem [shape: f32[64,32], index: 6, kind: input, shape index: {}]   ;;  %s3069_s7 = inlined_call_operand.hbm [shape: f32[16,32], index: 7, kind: output, shape index: {}]  }
   0x1   :  { %13 = vsyncpa [#allocation6], 0 }
   0x2   :  { %14 = vsyncpa [#allocation4], 0  ;;  %s2677_s24 = smov [#allocation5]   ;;  %s2678_s26 = smov [#allocation2]  }
   0x3   :  { %s32_s25 = sshll.u32 %s2677_s24, 4  ;;  %s20_s27 = sshll.u32 %s2678_s26, 4  ;;  %s33_s25 = int_to_ptr.vmem [resolvable:$true] %s32_s25  ;;  %s21_s27 = int_to_ptr.vmem [resolvable:$true] %s20_s27 }
   0x4   :  { %s2599_s28 = scalar_lea.vmem %s33_s25, 256  ;;  %p2604_p1 = scmp.lt.s32.totalorder %s33_s25, %s33_s25 }
   0x5   :  { %p2600_p0 = scmp.ne.s32.totalorder %s33_s25, %s2599_s28  ;;  %p2605_p2 = scmp.lt.s32.totalorder %s2599_s28, %s2599_s28 }
   0x7   :  { %p2606_p3 = por %p2605_p2, %p2604_p1 }
   0x9   :  { %p2607_p4 = pnand %p2606_p3, %p2600_p0 }
   0xb   :  { %2610 = shalt.err (!%p2607_p4)
}
   0xc   :  { %s2679_s29 = smov 128   ;;  %s2680_s30 = smov 8  }
   0xd   :  { %38 = dma.hbm_to_vmem [thread:$0]  %s3063_s1, 256, %s33_s25, [#allocation6], %s2679_s29, %s2679_s29, %s2680_s30  }
   0xe   :  { %s2619_s10 = scalar_lea.vmem %s21_s27, 256  ;;  %p2624_p6 = scmp.lt.s32.totalorder %s21_s27, %s21_s27 }
   0xf   :  { %p2620_p5 = scmp.ne.s32.totalorder %s21_s27, %s2619_s10  ;;  %p2625_p7 = scmp.lt.s32.totalorder %s2619_s10, %s2619_s10 }
  0x11   :  { %p2626_p8 = por %p2625_p7, %p2624_p6 }
  0x13   :  { %p2627_p9 = pnand %p2626_p8, %p2620_p5 }
  0x15   :  { %2630 = shalt.err (!%p2627_p9)
}
  0x16   :  { %26 = dma.hbm_to_vmem [thread:$0]  %s3062_s0, 256, %s21_s27, [#allocation3], %s2679_s29, %s2679_s29, %s2680_s30  }
  0x17   :  { %s2681_s13 = smov [#allocation7]  }
  0x18   :  { %s44_s14 = sshll.u32 %s2681_s13, 4  ;;  %s45_s14 = int_to_ptr.vmem [resolvable:$true] %s44_s14 }
  0x19   :  { %s2639_s15 = scalar_lea.vmem %s45_s14, 256  ;;  %p2644_p11 = scmp.lt.s32.totalorder %s45_s14, %s45_s14 }
  0x1a   :  { %p2640_p10 = scmp.ne.s32.totalorder %s45_s14, %s2639_s15  ;;  %p2645_p12 = scmp.lt.s32.totalorder %s2639_s15, %s2639_s15 }
  0x1c   :  { %p2646_p13 = por %p2645_p12, %p2644_p11 }
  0x1e   :  { %p2647_p0 = pnand %p2646_p13, %p2640_p10 }
  0x20   :  { %2650 = shalt.err (!%p2647_p0)
}
  0x21   :  { %50 = dma.hbm_to_vmem [thread:$0]  %s3064_s2, 256, %s45_s14, [#allocation6], %s2679_s29, %s2679_s29, %s2680_s30  }
  0x22   :  { %2671 = dma.done.wait [#allocation3], 256  }
  0x23   :  { %2672 = vsyncadd [#allocation3], 4294967040 }
  0x24   :  { %2673 = dma.done.wait [#allocation6], 512  }
  0x25   :  { %2674 = vsyncadd [#allocation6], 4294966784  ;;  %v75_v0 = vld [vmem:[%s3065_s3 + $0x18] sm:$0xff]  ;;  %v74_v2 = vld [vmem:[%s3065_s3 + $0x10] sm:$0xff]  ;;  %vm92_vm0 = vcmask 261120   ;;  %v2682_v12 = vmov 0.0  }
  0x26   :  { %v79_v1 = vld [vmem:[%s3066_s4 + $0x18] sm:$0xff]  ;;  %2379 = vmatprep.subr.mxu0 %v75_v0  ;;  %v78_v3 = vld [vmem:[%s3066_s4 + $0x10] sm:$0xff]  ;;  %v73_v4 = vld [vmem:[%s3065_s3 + $0x8] sm:$0xff]  ;;  %vm2683_vm1 = vmmov 0   ;;  %vm334_vm2 = vcmask 130048   ;;  %vm412_vm4 = vcmask 64512  }
  0x27   :  { %2390 = vmatprep.subr.mxu1 %v79_v1  ;;  %2380 = vmatpush3.msra.mxu0 %v75_v0  ;;  %v77_v5 = vld [vmem:[%s3066_s4 + $0x8] sm:$0xff]  ;;  %v72_v6 = vld [vmem:[%s3065_s3] sm:$0xff]  ;;  %v70_v9 = vld [vmem:[#allocation5] sm:$0xff]  ;;  %s2685_s1 = smov 96   ;;  %s2686_s2 = smov 80  }
  0x28   :  { %2391 = vmatpush3.msra.mxu1 %v79_v1  ;;  %2381 = vmatprep.subr.mxu0 %v74_v2  ;;  %v76_v7 = vld [vmem:[%s3066_s4] sm:$0xff]  ;;  %v69_v10 = vld [vmem:[#allocation2 + $0x8] sm:$0xff]  ;;  %v71_v11 = vld [vmem:[#allocation5 + $0x8] sm:$0xff] }
  0x29   :  { %2392 = vmatprep.subr.mxu1 %v78_v3  ;;  %2382 = vmatpush3.msra.mxu0 %v74_v2  ;;  %v68_v8 = vld [vmem:[#allocation2] sm:$0xff]  ;;  %v83_v13 = vld [vmem:[%s3067_s5 + $0x18] sm:$0xff]  ;;  %v82_v14 = vld [vmem:[%s3067_s5 + $0x10] sm:$0xff] }
  0x2a   :  { %2393 = vmatpush3.msra.mxu1 %v78_v3  ;;  %2383 = vmatprep.subr.mxu0 %v73_v4  ;;  %v81_v15 = vld [vmem:[%s3067_s5 + $0x8] sm:$0xff]  ;;  %v80_v16 = vld [vmem:[%s3067_s5] sm:$0xff]  ;;  %s2684_s5 = smov 112   ;;  %v2849_v48 = vld [vmem:[%s3068_s6 + $0x18] sm:$0xff] }
  0x2b   :  { %2394 = vmatprep.subr.mxu1 %v77_v5  ;;  %2384 = vmatpush3.msra.mxu0 %v73_v4  ;;  %v2824_v26 = vld [vmem:[#allocation7] sm:$0xff]  ;;  %v2854_v49 = vld [vmem:[%s3068_s6 + $0x10] sm:$0xff]  ;;  %v2864_v54 = vld [vmem:[%s3068_s6 + $0x8] sm:$0xff] }
  0x2c   :  { %2395 = vmatpush3.msra.mxu1 %v77_v5  ;;  %2385 = vmatprep.subr.mxu0 %v72_v6  ;;  %vm333_vm3 = vcmp.ne.f32.partialorder %v2824_v26, 0.0  ;;  %v2870_v55 = vld [vmem:[%s3068_s6] sm:$0xff] }
  0x2d   :  { %2396 = vmatprep.subr.mxu1 %v76_v7  ;;  %2386 = vmatpush3.msra.mxu0 %v72_v6 }
  0x2e   :  { %2387 = vmatprep.mubr.msk.f32.mxu0 %vm92_vm0, %v68_v8  ;;  %2397 = vmatpush3.msra.mxu1 %v76_v7 }
  0x2f   :  { %2398 = vmatprep.mubr.msk.f32.mxu1 %vm92_vm0, %v70_v9  ;;  %2388 = vmatmul.mubr.msk.f32.vlgmr.msra.gmra.mxu0 %vm92_vm0, %v69_v10 }
  0x30   :  { %2399 = vmatmul.mubr.msk.f32.vlgmr.msra.gmra.mxu1 %vm92_vm0, %v71_v11  ;;  %2409 = vmatprep.mubr.msk.f32.mxu0 %vm92_vm0, %v70_v9 }
  0x31   :  { %2412 = vmatprep.subr.mxu1 %v2682_v12  ;;  %2414 = vmatprep.mubr.msk.f32.mxu1 %vm2683_vm1, %v2682_v12 }
  0x32   :  { %2401 = vmatprep.subr.mxu0 %v83_v13 }
  0x33   :  { %2402 = vmatpush3.msra.mxu0 %v83_v13  ;;  %v2905_v13 = vld [vmem:[%s3068_s6 + $0x28] sm:$0xff] }
  0x34   :  { %2403 = vmatprep.subr.mxu0 %v82_v14 }
  0x35   :  { %2404 = vmatpush3.msra.mxu0 %v82_v14  ;;  %v2910_v14 = vld [vmem:[%s3068_s6 + $0x20] sm:$0xff] }
  0x36   :  { %2405 = vmatprep.subr.mxu0 %v81_v15 }
  0x37   :  { %2406 = vmatpush3.msra.mxu0 %v81_v15 }
  0x38   :  { %2407 = vmatprep.subr.mxu0 %v80_v16 }
  0x39   :  { %2408 = vmatpush3.msra.mxu0 %v80_v16 }
  0x3a   :  { %2410 = vmatmul.mubr.msk.f32.vlgmr.msra.gmra.mxu0 %vm92_vm0, %v71_v11  ;;  %2422 = vmatprep.subr.mxu0 %v2682_v12 }
  0x3b   :  { %2424 = vmatprep.mubr.msk.f32.mxu0 %vm2683_vm1, %v2682_v12 }
  0xef   :  { %v2794_v17 = vpop.f32.mrf.mxu0 }
  0xf0   :  { %v2796_v18 = vpop.f32.mrf.mxu1 }
  0xf1   :  { %v165_v19 = vpop.f32.mrf.mxu0 }
  0xf2   :  { %v2798_v20 = vpop.f32.mrf.mxu1  ;;  %v2800_v21 = vmul.f32 0.25, %v165_v19 }
  0xf3   :  { %499 = vrot.lane.b32.xlu0 %v2798_v20, %s2684_s5  ;;  %2413 = vmatpush3.xpose.msk.msra.mxu1 %vm334_vm2, %v2798_v20 }
  0xf4   :  { %2417 = vmatprep.subr.mxu1 %v2682_v12 }
  0xf6   :  { %2415 = vmatmul.mubr.msk.f32.vlgmr.msra.gmra.mxu1 %vm334_vm2, %v2800_v21 }
  0xf7   :  { %497 = vrot.lane.b32.xlu0 %v2800_v21, %s2684_s5  ;;  %2419 = vmatprep.mubr.msk.f32.mxu1 %vm2683_vm1, %v2682_v12 }
  0xfa   :  { %v2813_v22 = vpop.f32.mrf.mxu0 }
  0xfc   :  { %v2815_v23 = vpop.f32.mrf.mxu0 }
  0xfd   :  { %2418 = vmatpush3.msra.mxu1 %v2815_v23 }
  0xfe   :  { %2427 = vmatprep.subr.mxu1 %v2682_v12 }
 0x165   :  { %v500_v24 = vpop.permute.xlu0 %499 }
 0x166   :  { %2423 = vmatpush3.xpose.msk.msra.mxu0 %vm334_vm2, %v500_v24 }
 0x167   :  { %2432 = vmatprep.subr.mxu0 %v2682_v12 }
 0x169   :  { %v498_v25 = vpop.permute.xlu0 %497 }
 0x16a   :  { %2425 = vmatmul.mubr.msk.f32.vlgmr.msra.gmra.mxu0 %vm334_vm2, %v498_v25 }
 0x16b   :  { %2436 = vmatprep.mubr.msk.f32.mxu0 %vm2683_vm1, %v2682_v12  ;;  %2433 = vmatpush3.msra.mxu0 %v2849_v48 }
 0x16c   :  { %2434 = vmatprep.subr.mxu0 %v2682_v12 }
 0x16d   :  { %2435 = vmatpush3.msra.mxu0 %v2854_v49 }
 0x16e   :  { %2446 = vmatprep.subr.mxu0 %v2682_v12 }
 0x1b6   :  { %v407_v27 = vpop.f32.mrf.mxu1 }
 0x1b7   :  { %v411_v28 = vsel %vm333_vm3, %v407_v27, -1e+08 }
 0x1b8   :  { %v2416_v29 = vpop.f32.mrf.mxu1  ;;  %v413_v30 = vsel %vm412_vm4, %v411_v28, -inf }
 0x1b9   :  { %414 = vmax.xlane.f32.xlu1 %v413_v30 }
 0x22a   :  { %v571_v31 = vpop.f32.mrf.mxu0 }
 0x22b   :  { %v575_v32 = vsel %vm333_vm3, %v571_v31, -1e+08 }
 0x22c   :  { %v2426_v33 = vpop.f32.mrf.mxu0  ;;  %v576_v34 = vsel %vm412_vm4, %v575_v32, -inf }
 0x22d   :  { %577 = vmax.xlane.f32.xlu1 %v576_v34 }
 0x242   :  { %v415_v35 = vpop.xlane.xlu1 %414 }
 0x243   :  { %v416_v36 = vsub.f32 %v411_v28, %v415_v35 }
 0x245   :  { %v417_v37 = vmul.f32 1.442695, %v416_v36  ;;  %v2933_v36 = vmul.f32 0.25, %v2794_v17 }
 0x247   :  { %2559 = vpow2.f32 %v417_v37 }
 0x254   :  { %v2560_v38 = vpop.eup %2559 }
 0x255   :  { %v419_v39 = vsel %vm412_vm4, %v2560_v38, 0.0 }
 0x256   :  { %420 = vadd.xlane.f32.xlu0 %v419_v39 }
 0x26c   :  { %900 = vrot.lane.b32.xlu0 %v2815_v23, %s2685_s1 }
 0x2b6   :  { %v578_v40 = vpop.xlane.xlu1 %577 }
 0x2b7   :  { %v579_v41 = vsub.f32 %v575_v32, %v578_v40  ;;  %v2942_v40 = vld [vmem:[%s3068_s6 + $0x38] sm:$0xff] }
 0x2b9   :  { %v580_v42 = vmul.f32 1.442695, %v579_v41  ;;  %v2947_v41 = vld [vmem:[%s3068_s6 + $0x30] sm:$0xff]  ;;  %s2687_s6 = smov [#allocation8]  }
 0x2ba   :  { %s2254_s3 = sshll.u32 %s2687_s6, 4  ;;  %s2255_s3 = int_to_ptr.vmem [resolvable:$true] %s2254_s3 }
 0x2bb   :  { %2561 = vpow2.f32 %v580_v42  ;;  %s2651_s4 = scalar_lea.vmem %s2255_s3, 256  ;;  %p2656_p2 = scmp.lt.s32.totalorder %s2255_s3, %s2255_s3 }
 0x2bc   :  { %p2652_p1 = scmp.ne.s32.totalorder %s2255_s3, %s2651_s4  ;;  %p2657_p3 = scmp.lt.s32.totalorder %s2651_s4, %s2651_s4 }
 0x2be   :  { %p2658_p4 = por %p2657_p3, %p2656_p2 }
 0x2c0   :  { %p2659_p5 = pnand %p2658_p4, %p2652_p1 }
 0x2c8   :  { %v2562_v43 = vpop.eup %2561 }
 0x2c9   :  { %v582_v44 = vsel %vm412_vm4, %v2562_v43, 0.0 }
 0x2ca   :  { %583 = vadd.xlane.f32.xlu1 %v582_v44 }
 0x2db   :  { %588 = vrot.lane.b32.xlu1 %v2815_v23, %s2684_s5 }
 0x2df   :  { %v421_v45 = vpop.xlane.xlu0 %420  ;;  %812 = vrot.lane.b32.xlu1 %v2798_v20, %s2685_s1 }
 0x2e0   :  { %2563 = vrcp.f32 %v421_v45 }
 0x2e3   :  { %810 = vrot.lane.b32.xlu1 %v2800_v21, %s2685_s1  ;;  %v901_v57 = vpop.permute.xlu0 %900 }
 0x2ed   :  { %v2564_v46 = vpop.eup %2563 }
 0x2ee   :  { %v423_v47 = vmul.f32 %v2564_v46, %v2560_v38  ;;  %v2972_v46 = vld [vmem:[#allocation7 + $0x8] sm:$0xff] }
 0x2ef   :  { %vm1293_vm5 = vcmp.ne.f32.partialorder %v2972_v46, 0.0 }
 0x2f0   :  { %2420 = vmatmul.mubr.msk.f32.vlgmr.msra.gmra.mxu1 %vm412_vm4, %v423_v47 }
 0x2f1   :  { %2429 = vmatprep.mubr.msk.f32.mxu1 %vm2683_vm1, %v2682_v12 }
 0x353   :  { %v584_v50 = vpop.xlane.xlu1 %583 }
 0x354   :  { %2565 = vrcp.f32 %v584_v50 }
 0x357   :  { %v589_v51 = vpop.permute.xlu1 %588 }
 0x358   :  { %2428 = vmatpush3.msra.mxu1 %v589_v51 }
 0x359   :  { %2439 = vmatprep.subr.mxu1 %v2682_v12 }
 0x35b   :  { %v813_v59 = vpop.permute.xlu1 %812 }
 0x35f   :  { %v811_v62 = vpop.permute.xlu1 %810 }
 0x361   :  { %v2566_v52 = vpop.eup %2565 }
 0x362   :  { %v586_v53 = vmul.f32 %v2566_v52, %v2562_v43 }
 0x364   :  { %2430 = vmatmul.mubr.msk.f32.vlgmr.msra.gmra.mxu1 %vm412_vm4, %v586_v53 }
 0x365   :  { %2440 = vmatpush3.msra.mxu1 %v2864_v54  ;;  %2443 = vmatprep.mubr.msk.f32.mxu1 %vm2683_vm1, %v2682_v12 }
 0x366   :  { %2441 = vmatprep.subr.mxu1 %v2682_v12 }
 0x367   :  { %2442 = vmatpush3.msra.mxu1 %v2870_v55 }
 0x368   :  { %2451 = vmatprep.subr.mxu1 %v2682_v12 }
 0x3b0   :  { %v493_v56 = vpop.f32.mrf.mxu1 }
 0x3b1   :  { %2444 = vmatmul.mubr.msk.f32.vlgmr.msra.gmra.mxu1 %vm334_vm2, %v493_v56 }
 0x3b2   :  { %2452 = vmatpush3.msra.mxu1 %v901_v57  ;;  %v2421_v58 = vpop.f32.mrf.mxu1  ;;  %2453 = vmatprep.mubr.msk.f32.mxu1 %vm2683_vm1, %v2682_v12 }
 0x3b3   :  { %2463 = vmatprep.subr.mxu1 %v2682_v12 }
 0x424   :  { %v660_v60 = vpop.f32.mrf.mxu1 }
 0x425   :  { %2437 = vmatmul.mubr.msk.f32.vlgmr.msra.gmra.mxu0 %vm334_vm2, %v660_v60 }
 0x426   :  { %2447 = vmatpush3.xpose.msk.msra.mxu0 %vm334_vm2, %v813_v59  ;;  %v2431_v61 = vpop.f32.mrf.mxu1  ;;  %2448 = vmatprep.mubr.msk.f32.mxu0 %vm2683_vm1, %v2682_v12 }
 0x427   :  { %2456 = vmatprep.subr.mxu0 %v2682_v12 }
 0x429   :  { %2449 = vmatmul.mubr.msk.f32.vlgmr.msra.gmra.mxu0 %vm334_vm2, %v811_v62 }
 0x42a   :  { %2460 = vmatprep.mubr.msk.f32.mxu0 %vm2683_vm1, %v2682_v12  ;;  %2457 = vmatpush3.msra.mxu0 %v2905_v13 }
 0x42b   :  { %2458 = vmatprep.subr.mxu0 %v2682_v12 }
 0x42c   :  { %2459 = vmatpush3.msra.mxu0 %v2910_v14 }
 0x42d   :  { %2468 = vmatprep.subr.mxu0 %v2682_v12 }
 0x471   :  { %v806_v63 = vpop.f32.mrf.mxu1 }
 0x473   :  { %v2445_v0 = vpop.f32.mrf.mxu1 }
 0x4e5   :  { %v733_v1 = vpop.f32.mrf.mxu0 }
 0x4e6   :  { %v807_v26 = vadd.f32 %v806_v63, %v733_v1 }
 0x4e7   :  { %v2438_v2 = vpop.f32.mrf.mxu0 }
 0x4e9   :  { %v884_v3 = vpop.f32.mrf.mxu0 }
 0x4ea   :  { %v888_v4 = vsel %vm333_vm3, %v884_v3, -1e+08 }
 0x4eb   :  { %v2450_v5 = vpop.f32.mrf.mxu0  ;;  %v889_v6 = vsel %vm412_vm4, %v888_v4, -inf }
 0x4ec   :  { %890 = vmax.xlane.f32.xlu1 %v889_v6 }
 0x4fd   :  { %1140 = vrot.lane.b32.xlu1 %v2815_v23, %s2686_s2 }
 0x501   :  { %1457 = vrot.lane.b32.xlu1 %v2796_v18, %s2684_s5 }
 0x575   :  { %v891_v7 = vpop.xlane.xlu1 %890 }
 0x576   :  { %v892_v8 = vsub.f32 %v888_v4, %v891_v7 }
 0x578   :  { %v893_v9 = vmul.f32 1.442695, %v892_v8 }
 0x579   :  { %v1141_v24 = vpop.permute.xlu1 %1140 }
 0x57a   :  { %2567 = vpow2.f32 %v893_v9 }
 0x57d   :  { %v1458_v17 = vpop.permute.xlu1 %1457 }
 0x587   :  { %v2568_v10 = vpop.eup %2567 }
 0x588   :  { %v895_v11 = vsel %vm412_vm4, %v2568_v10, 0.0 }
 0x589   :  { %896 = vadd.xlane.f32.xlu0 %v895_v11 }
 0x59f   :  { %1052 = vrot.lane.b32.xlu0 %v2798_v20, %s2686_s2 }
 0x5a3   :  { %1050 = vrot.lane.b32.xlu0 %v2800_v21, %s2686_s2 }
 0x612   :  { %v897_v15 = vpop.xlane.xlu0 %896 }
 0x613   :  { %2569 = vrcp.f32 %v897_v15 }
 0x616   :  { %v1053_v19 = vpop.permute.xlu0 %1052 }
 0x61a   :  { %v1051_v21 = vpop.permute.xlu0 %1050 }
 0x620   :  { %v2570_v16 = vpop.eup %2569 }
 0x621   :  { %v899_v20 = vmul.f32 %v2570_v16, %v2568_v10 }
 0x623   :  { %2454 = vmatmul.mubr.msk.f32.vlgmr.msra.gmra.mxu1 %vm412_vm4, %v899_v20 }
 0x624   :  { %2464 = vmatpush3.xpose.msk.msra.mxu1 %vm334_vm2, %v1053_v19  ;;  %2465 = vmatprep.mubr.msk.f32.mxu1 %vm2683_vm1, %v2682_v12 }
 0x625   :  { %2473 = vmatprep.subr.mxu1 %v2682_v12 }
 0x627   :  { %2466 = vmatmul.mubr.msk.f32.vlgmr.msra.gmra.mxu1 %vm334_vm2, %v1051_v21 }
 0x628   :  { %2477 = vmatprep.mubr.msk.f32.mxu1 %vm2683_vm1, %v2682_v12  ;;  %2474 = vmatpush3.msra.mxu1 %v2942_v40 }
 0x629   :  { %2475 = vmatprep.subr.mxu1 %v2682_v12 }
 0x62a   :  { %2476 = vmatpush3.msra.mxu1 %v2947_v41 }
 0x62b   :  { %2485 = vmatprep.subr.mxu1 %v2682_v12 }
 0x6e3   :  { %v972_v23 = vpop.f32.mrf.mxu1 }
 0x6e4   :  { %2461 = vmatmul.mubr.msk.f32.vlgmr.msra.gmra.mxu0 %vm334_vm2, %v972_v23 }
 0x6e5   :  { %2469 = vmatpush3.msra.mxu0 %v1141_v24  ;;  %v2455_v25 = vpop.f32.mrf.mxu1  ;;  %2470 = vmatprep.mubr.msk.f32.mxu0 %vm2683_vm1, %v2682_v12 }
 0x6e6   :  { %2480 = vmatprep.subr.mxu0 %v2682_v12 }
 0x6e7   :  { %v1124_v27 = vpop.f32.mrf.mxu1 }
 0x6e8   :  { %v1128_v28 = vsel %vm333_vm3, %v1124_v27, -1e+08 }
 0x6e9   :  { %v2467_v29 = vpop.f32.mrf.mxu1  ;;  %v1129_v30 = vsel %vm412_vm4, %v1128_v28, -inf }
 0x6ea   :  { %1130 = vmax.xlane.f32.xlu0 %v1129_v30 }
 0x773   :  { %v1131_v31 = vpop.xlane.xlu0 %1130 }
 0x774   :  { %v1132_v32 = vsub.f32 %v1128_v28, %v1131_v31 }
 0x776   :  { %v1133_v33 = vmul.f32 1.442695, %v1132_v32 }
 0x778   :  { %2571 = vpow2.f32 %v1133_v33 }
 0x785   :  { %v2572_v34 = vpop.eup %2571 }
 0x786   :  { %v1135_v35 = vsel %vm412_vm4, %v2572_v34, 0.0 }
 0x787   :  { %1136 = vadd.xlane.f32.xlu1 %v1135_v35 }
 0x798   :  { %1455 = vrot.lane.b32.xlu1 %v2933_v36, %s2684_s5 }
 0x7a4   :  { %v1045_v37 = vpop.f32.mrf.mxu0 }
 0x7a5   :  { %v2937_v38 = vadd.f32 %v1045_v37, %v807_v26 }
 0x7a6   :  { %v2462_v39 = vpop.f32.mrf.mxu0 }
 0x810   :  { %v1137_v42 = vpop.xlane.xlu1 %1136 }
 0x811   :  { %2573 = vrcp.f32 %v1137_v42 }
 0x814   :  { %v1456_v45 = vpop.permute.xlu1 %1455 }
 0x81e   :  { %v2574_v43 = vpop.eup %2573 }
 0x81f   :  { %v1139_v44 = vmul.f32 %v2574_v43, %v2572_v34 }
 0x821   :  { %2471 = vmatmul.mubr.msk.f32.vlgmr.msra.gmra.mxu0 %vm412_vm4, %v1139_v44 }
 0x822   :  { %2481 = vmatpush3.xpose.msk.msra.mxu0 %vm334_vm2, %v2796_v18  ;;  %2482 = vmatprep.mubr.msk.f32.mxu0 %vm2683_vm1, %v2682_v12 }
 0x823   :  { %2490 = vmatprep.subr.mxu0 %v2682_v12 }
 0x825   :  { %2483 = vmatmul.mubr.msk.f32.vlgmr.msra.gmra.mxu0 %vm334_vm2, %v2933_v36 }
 0x826   :  { %2491 = vmatpush3.xpose.msk.msra.mxu0 %vm334_vm2, %v1458_v17  ;;  %2492 = vmatprep.mubr.msk.f32.mxu0 %vm2683_vm1, %v2682_v12 }
 0x827   :  { %2500 = vmatprep.subr.mxu0 %v2682_v12 }
 0x829   :  { %2493 = vmatmul.mubr.msk.f32.vlgmr.msra.gmra.mxu0 %vm334_vm2, %v1456_v45 }
 0x82a   :  { %2501 = vmatpush3.msra.mxu0 %v2849_v48  ;;  %2504 = vmatprep.mubr.msk.f32.mxu0 %vm2683_vm1, %v2682_v12 }
 0x82b   :  { %2502 = vmatprep.subr.mxu0 %v2682_v12 }
 0x82c   :  { %2503 = vmatpush3.msra.mxu0 %v2854_v49 }
 0x82d   :  { %2514 = vmatprep.subr.mxu0 %v2682_v12 }
 0x8e1   :  { %v1212_v47 = vpop.f32.mrf.mxu0 }
 0x8e2   :  { %2478 = vmatmul.mubr.msk.f32.vlgmr.msra.gmra.mxu1 %vm334_vm2, %v1212_v47 }
 0x8e3   :  { %2486 = vmatpush3.msra.mxu1 %v2813_v22  ;;  %v2472_v50 = vpop.f32.mrf.mxu0  ;;  %2487 = vmatprep.mubr.msk.f32.mxu1 %vm2683_vm1, %v2682_v12 }
 0x8e4   :  { %2495 = vmatprep.subr.mxu1 %v2682_v12 }
 0x8e5   :  { %v1366_v48 = vpop.f32.mrf.mxu0 }
 0x8e6   :  { %v1370_v49 = vsel %vm1293_vm5, %v1366_v48, -1e+08 }
 0x8e7   :  { %v2484_v51 = vpop.f32.mrf.mxu0  ;;  %v1371_v52 = vsel %vm412_vm4, %v1370_v49, -inf }
 0x8e8   :  { %1372 = vmax.xlane.f32.xlu1 %v1371_v52 }
 0x8e9   :  { %v1529_v53 = vpop.f32.mrf.mxu0 }
 0x8ea   :  { %v1533_v56 = vsel %vm1293_vm5, %v1529_v53, -1e+08 }
 0x8eb   :  { %v2494_v57 = vpop.f32.mrf.mxu0  ;;  %v1534_v58 = vsel %vm412_vm4, %v1533_v56, -inf }
 0x8ec   :  { %1535 = vmax.xlane.f32.xlu0 %v1534_v58 }
 0x8f9   :  { %1768 = vrot.lane.b32.xlu1 %v2933_v36, %s2685_s1 }
 0x971   :  { %v1373_v59 = vpop.xlane.xlu1 %1372 }
 0x972   :  { %v1374_v60 = vsub.f32 %v1370_v49, %v1373_v59 }
 0x974   :  { %v1375_v61 = vmul.f32 1.442695, %v1374_v60 }
 0x975   :  { %v1536_v62 = vpop.xlane.xlu0 %1535 }
 0x976   :  { %2575 = vpow2.f32 %v1375_v61  ;;  %v1537_v63 = vsub.f32 %v1533_v56, %v1536_v62 }
 0x978   :  { %v1538_v0 = vmul.f32 1.442695, %v1537_v63 }
 0x97a   :  { %2577 = vpow2.f32 %v1538_v0 }
 0x983   :  { %v2576_v1 = vpop.eup %2575 }
 0x984   :  { %v1377_v2 = vsel %vm412_vm4, %v2576_v1, 0.0 }
 0x985   :  { %1378 = vadd.xlane.f32.xlu0 %v1377_v2 }
 0x987   :  { %v2578_v3 = vpop.eup %2577 }
 0x988   :  { %v1540_v4 = vsel %vm412_vm4, %v2578_v3, 0.0 }
 0x989   :  { %1541 = vadd.xlane.f32.xlu0 %v1540_v4 }
 0x99f   :  { %1546 = vrot.lane.b32.xlu0 %v2813_v22, %s2684_s5 }
 0x9a2   :  { %v1285_v5 = vpop.f32.mrf.mxu1 }
 0x9a3   :  { %v1289_v6 = vadd.f32 %v1285_v5, %v2937_v38  ;;  %1770 = vrot.lane.b32.xlu0 %v2796_v18, %s2685_s1 }
 0x9a4   :  { %v2479_v7 = vpop.f32.mrf.mxu1 }
 0x9a5   :  { %1290 = vst.msk [vmem:[#allocation8] sm:$0xff] %vm92_vm0, %v1289_v6 }
 0xa0e   :  { %v1379_v8 = vpop.xlane.xlu0 %1378 }
 0xa0f   :  { %2579 = vrcp.f32 %v1379_v8 }
 0xa12   :  { %v1542_v9 = vpop.xlane.xlu0 %1541 }
 0xa13   :  { %2581 = vrcp.f32 %v1542_v9 }
 0xa16   :  { %v1547_v15 = vpop.permute.xlu0 %1546 }
 0xa1a   :  { %v1771_v24 = vpop.permute.xlu0 %1770 }
 0xa1c   :  { %v2580_v10 = vpop.eup %2579 }
 0xa1d   :  { %v1381_v11 = vmul.f32 %v2580_v10, %v2576_v1 }
 0xa1f   :  { %2488 = vmatmul.mubr.msk.f32.vlgmr.msra.gmra.mxu1 %vm412_vm4, %v1381_v11 }
 0xa20   :  { %v2582_v16 = vpop.eup %2581  ;;  %2496 = vmatpush3.msra.mxu1 %v1547_v15  ;;  %2497 = vmatprep.mubr.msk.f32.mxu1 %vm2683_vm1, %v2682_v12 }
 0xa21   :  { %v1544_v19 = vmul.f32 %v2582_v16, %v2578_v3  ;;  %2507 = vmatprep.subr.mxu1 %v2682_v12 }
 0xa23   :  { %2498 = vmatmul.mubr.msk.f32.vlgmr.msra.gmra.mxu1 %vm412_vm4, %v1544_v19 }
 0xa24   :  { %2508 = vmatpush3.msra.mxu1 %v2864_v54  ;;  %2511 = vmatprep.mubr.msk.f32.mxu1 %vm2683_vm1, %v2682_v12 }
 0xa25   :  { %2509 = vmatprep.subr.mxu1 %v2682_v12 }
 0xa26   :  { %2510 = vmatpush3.msra.mxu1 %v2870_v55  ;;  %v1769_v55 = vpop.permute.xlu1 %1768 }
 0xa27   :  { %2519 = vmatprep.subr.mxu1 %v2682_v12 }
 0xadf   :  { %v1451_v20 = vpop.f32.mrf.mxu1 }
 0xae0   :  { %2512 = vmatmul.mubr.msk.f32.vlgmr.msra.gmra.mxu1 %vm334_vm2, %v1451_v20 }
 0xae1   :  { %v2489_v21 = vpop.f32.mrf.mxu1  ;;  %2521 = vmatprep.mubr.msk.f32.mxu1 %vm2683_vm1, %v2682_v12 }
 0xae3   :  { %v1618_v23 = vpop.f32.mrf.mxu1 }
 0xae4   :  { %2505 = vmatmul.mubr.msk.f32.vlgmr.msra.gmra.mxu0 %vm334_vm2, %v1618_v23 }
 0xae5   :  { %2515 = vmatpush3.xpose.msk.msra.mxu0 %vm334_vm2, %v1771_v24  ;;  %v2499_v54 = vpop.f32.mrf.mxu1  ;;  %2516 = vmatprep.mubr.msk.f32.mxu0 %vm2683_vm1, %v2682_v12 }
 0xae6   :  { %2524 = vmatprep.subr.mxu0 %v2682_v12 }
 0xae8   :  { %2517 = vmatmul.mubr.msk.f32.vlgmr.msra.gmra.mxu0 %vm334_vm2, %v1769_v55 }
 0xae9   :  { %2525 = vmatpush3.msra.mxu0 %v2905_v13  ;;  %2528 = vmatprep.mubr.msk.f32.mxu0 %vm2683_vm1, %v2682_v12 }
 0xaea   :  { %2526 = vmatprep.subr.mxu0 %v2682_v12 }
 0xaeb   :  { %2527 = vmatpush3.msra.mxu0 %v2910_v14 }
 0xaec   :  { %2536 = vmatprep.subr.mxu0 %v2682_v12 }
 0xba0   :  { %v1764_v25 = vpop.f32.mrf.mxu1 }
 0xba2   :  { %v2513_v27 = vpop.f32.mrf.mxu1 }
 0xba4   :  { %v1691_v28 = vpop.f32.mrf.mxu0 }
 0xba5   :  { %v1765_v29 = vadd.f32 %v1764_v25, %v1691_v28 }
 0xba6   :  { %v2506_v30 = vpop.f32.mrf.mxu0 }
 0xba8   :  { %v1842_v31 = vpop.f32.mrf.mxu0 }
 0xba9   :  { %v1846_v32 = vsel %vm1293_vm5, %v1842_v31, -1e+08 }
 0xbaa   :  { %v2518_v33 = vpop.f32.mrf.mxu0  ;;  %v1847_v13 = vsel %vm412_vm4, %v1846_v32, -inf }
 0xbab   :  { %1848 = vmax.xlane.f32.xlu0 %v1847_v13 }
 0xbc1   :  { %1858 = vrot.lane.b32.xlu0 %v2813_v22, %s2685_s1 }
 0xbc5   :  { %2008 = vrot.lane.b32.xlu0 %v2933_v36, %s2686_s2 }
 0xc34   :  { %v1849_v14 = vpop.xlane.xlu0 %1848 }
 0xc35   :  { %v1850_v34 = vsub.f32 %v1846_v32, %v1849_v14 }
 0xc37   :  { %v1851_v35 = vmul.f32 1.442695, %v1850_v34 }
 0xc38   :  { %v1859_v26 = vpop.permute.xlu0 %1858 }
 0xc39   :  { %2583 = vpow2.f32 %v1851_v35  ;;  %2520 = vmatpush3.msra.mxu1 %v1859_v26 }
 0xc3a   :  { %2531 = vmatprep.subr.mxu1 %v2682_v12 }
 0xc3c   :  { %v2009_v43 = vpop.permute.xlu0 %2008 }
 0xc46   :  { %v2584_v37 = vpop.eup %2583 }
 0xc47   :  { %v1853_v38 = vsel %vm412_vm4, %v2584_v37, 0.0 }
 0xc48   :  { %1854 = vadd.xlane.f32.xlu1 %v1853_v38 }
 0xc59   :  { %2010 = vrot.lane.b32.xlu1 %v2796_v18, %s2686_s2 }
 0xcd1   :  { %v1855_v39 = vpop.xlane.xlu1 %1854 }
 0xcd2   :  { %2585 = vrcp.f32 %v1855_v39 }
 0xcd5   :  { %v2011_v36 = vpop.permute.xlu1 %2010 }
 0xcdf   :  { %v2586_v17 = vpop.eup %2585 }
 0xce0   :  { %v1857_v42 = vmul.f32 %v2586_v17, %v2584_v37 }
 0xce2   :  { %2522 = vmatmul.mubr.msk.f32.vlgmr.msra.gmra.mxu1 %vm412_vm4, %v1857_v42 }
 0xce3   :  { %2532 = vmatpush3.xpose.msk.msra.mxu1 %vm334_vm2, %v2011_v36  ;;  %2533 = vmatprep.mubr.msk.f32.mxu1 %vm2683_vm1, %v2682_v12 }
 0xce4   :  { %2541 = vmatprep.subr.mxu1 %v2682_v12 }
 0xce6   :  { %2534 = vmatmul.mubr.msk.f32.vlgmr.msra.gmra.mxu1 %vm334_vm2, %v2009_v43 }
 0xce7   :  { %2542 = vmatpush3.msra.mxu1 %v2942_v40  ;;  %2545 = vmatprep.mubr.msk.f32.mxu1 %vm2683_vm1, %v2682_v12 }
 0xce8   :  { %2543 = vmatprep.subr.mxu1 %v2682_v12 }
 0xce9   :  { %2544 = vmatpush3.msra.mxu1 %v2947_v41 }
 0xda2   :  { %v1930_v18 = vpop.f32.mrf.mxu1 }
 0xda3   :  { %2529 = vmatmul.mubr.msk.f32.vlgmr.msra.gmra.mxu0 %vm334_vm2, %v1930_v18 }
 0xda4   :  { %v2523_v44 = vpop.f32.mrf.mxu1  ;;  %2538 = vmatprep.mubr.msk.f32.mxu0 %vm2683_vm1, %v2682_v12 }
 0xda6   :  { %v2082_v45 = vpop.f32.mrf.mxu1 }
 0xda7   :  { %v2086_v47 = vsel %vm1293_vm5, %v2082_v45, -1e+08 }
 0xda8   :  { %v2535_v50 = vpop.f32.mrf.mxu1  ;;  %v2087_v40 = vsel %vm412_vm4, %v2086_v47, -inf }
 0xda9   :  { %2088 = vmax.xlane.f32.xlu0 %v2087_v40 }
 0xdbf   :  { %2098 = vrot.lane.b32.xlu0 %v2813_v22, %s2686_s2 }
 0xe32   :  { %v2089_v48 = vpop.xlane.xlu0 %2088 }
 0xe33   :  { %v2090_v41 = vsub.f32 %v2086_v47, %v2089_v48 }
 0xe35   :  { %v2091_v49 = vmul.f32 1.442695, %v2090_v41 }
 0xe36   :  { %v2099_v51 = vpop.permute.xlu0 %2098 }
 0xe37   :  { %2587 = vpow2.f32 %v2091_v49  ;;  %2537 = vmatpush3.msra.mxu0 %v2099_v51 }
 0xe44   :  { %v2588_v52 = vpop.eup %2587 }
 0xe45   :  { %v2093_v12 = vsel %vm412_vm4, %v2588_v52, 0.0 }
 0xe46   :  { %2094 = vadd.xlane.f32.xlu1 %v2093_v12 }
 0xe63   :  { %v2003_v53 = vpop.f32.mrf.mxu0 }
 0xe64   :  { %v2007_v46 = vadd.f32 %v2003_v53, %v1765_v29 }
 0xe65   :  { %v2530_v56 = vpop.f32.mrf.mxu0 }
 0xecf   :  { %v2095_v57 = vpop.xlane.xlu1 %2094 }
 0xed0   :  { %2589 = vrcp.f32 %v2095_v57 }
 0xedd   :  { %v2590_v58 = vpop.eup %2589 }
 0xede   :  { %v2097_v59 = vmul.f32 %v2590_v58, %v2588_v52 }
 0xee0   :  { %2539 = vmatmul.mubr.msk.f32.vlgmr.msra.gmra.mxu0 %vm412_vm4, %v2097_v59 }
 0xfa0   :  { %v2170_v22 = vpop.f32.mrf.mxu0 }
 0xfa1   :  { %2546 = vmatmul.mubr.msk.f32.vlgmr.msra.gmra.mxu1 %vm334_vm2, %v2170_v22 }
 0xfa2   :  { %v2540_v60 = vpop.f32.mrf.mxu0 }
0x1061   :  { %v2243_v61 = vpop.f32.mrf.mxu1 }
0x1062   :  { %v2247_v62 = vadd.f32 %v2243_v61, %v2007_v46 }
0x1063   :  { %v2547_v63 = vpop.f32.mrf.mxu1 }
0x1064   :  { %2248 = vst.msk [vmem:[#allocation8 + $0x8] sm:$0xff] %vm92_vm0, %v2247_v62 }
0x1065   :  { %2662 = shalt.err (!%p2659_p5)
}
0x1066   :  { %2260 = dma.vmem_to_hbm [thread:$0]  %s2255_s3, 256, %s3069_s7, [#allocation4], %s2679_s29, %s2679_s29, %s2680_s30  }
0x1067   :  { %2675 = dma.done.wait [#allocation4], 256  }
0x1068   :  { %2676 = vsyncadd [#allocation4], 4294967040 }
0x1069   :  { %2264 = vsyncpa [#allocation3], 1 }
0x106a   :  { %2265 = vsyncpa [#allocation6], 1 }
0x106b   :  { %2266 = vsyncpa [#allocation4], 1 }

</bundles_post_ra>
